<compile_context>
chip_gen: v5e
topology: v5e:2x2
jax: 0.10.0
libtpu: 0.0.40
codegen_flags: <defaults>
</compile_context>

<pallas_src>
import functools

import jax
import jax.numpy as jnp
from jax.experimental import pallas as pl
from jax.experimental.pallas import tpu as pltpu


LANE = 1024        # lane-dense last dim (multiple of 128)
ROW_BLOCK = 512    # sublane-dim tile; 512*1024*4B = 2 MiB per f32 buffer


def _gauss_noise_kernel(x_ref, n_ref, o_ref, *, stddev):
    x = x_ref[...]
    o_ref[...] = x + n_ref[...] * jnp.asarray(stddev, dtype=x.dtype)


def gauss_noise(x, stddev, key):
    """Adds N(0, stddev^2) noise to x (any shape, float dtype)."""
    assert jnp.issubdtype(x.dtype, jnp.floating), "GaussNoise expects float input"
    orig_shape = x.shape
    dtype = x.dtype
    total = x.size

    # Fresh standard-normal noise, same size as x (matches torch.randn(din.size())).
    noise = jax.random.normal(key, (total,), dtype=jnp.float32).astype(dtype)
    xf = x.reshape(total)

    # Flatten + pad to a lane-dense (rows, LANE) slab whose rows divide ROW_BLOCK.
    rows_needed = pl.cdiv(total, LANE)
    row_block = min(ROW_BLOCK, ((rows_needed + 7) // 8) * 8)   # keep sublane multiple of 8
    rows = pl.cdiv(rows_needed, row_block) * row_block
    padded = rows * LANE
    pad = padded - total
    xf = jnp.pad(xf, (0, pad))
    noise = jnp.pad(noise, (0, pad))
    x2d = xf.reshape(rows, LANE)
    n2d = noise.reshape(rows, LANE)

    grid = (rows // row_block,)
    block = pl.BlockSpec((row_block, LANE), lambda i: (i, 0))

    out2d = pl.pallas_call(
        functools.partial(_gauss_noise_kernel, stddev=float(stddev)),
        out_shape=jax.ShapeDtypeStruct((rows, LANE), dtype),
        grid=grid,
        in_specs=[block, block],
        out_specs=pl.BlockSpec((row_block, LANE), lambda i: (i, 0)),
        compiler_params=pltpu.CompilerParams(
            dimension_semantics=("parallel",),
        ),
    )(x2d, n2d)

    return out2d.reshape(padded)[:total].reshape(orig_shape)


if __name__ == "__main__":
    key = jax.random.PRNGKey(0)
    k_x, k_noise = jax.random.split(key)

    # NCHW input, small shapes: batch=2, channels=4, spatial=16
    x = jax.random.normal(k_x, (2, 4, 16, 16), dtype=jnp.float32)

    stddev = 0.1
    y = gauss_noise(x, stddev, k_noise)
    y = jax.block_until_ready(y)

    # Sanity checks: same shape/dtype, noise magnitude ~ stddev.
    assert y.shape == x.shape and y.dtype == x.dtype
    diff = y - x
    assert float(jnp.max(jnp.abs(diff))) > 0.0            # noise was added
    assert 0.0 < float(jnp.std(diff)) < 10.0 * stddev     # roughly scaled

    print("KERNEL_OK")
</pallas_src>

<mosaic_0001>
module attributes {stable_mosaic.version = 11 : i64} {
  func.func @_gauss_noise_kernel(%arg0: i32, %arg1: memref<8x1024xf32, #tpu.memory_space<vmem>>, %arg2: memref<8x1024xf32, #tpu.memory_space<vmem>>, %arg3: memref<8x1024xf32, #tpu.memory_space<vmem>>) attributes {dimension_semantics = [#tpu.dimension_semantics<parallel>], iteration_bounds = array<i64: 1>, scalar_prefetch = 0 : i64, scratch_operands = 0 : i64, tpu.core_type = #tpu.core_type<tc>, window_params = [{transform_indices = @transform_0, window_bounds = array<i64: 8, 1024>}, {transform_indices = @transform_1, window_bounds = array<i64: 8, 1024>}, {transform_indices = @transform_2, window_bounds = array<i64: 8, 1024>}]} {
    %c0 = arith.constant 0 : index
    %c0_0 = arith.constant 0 : index
    %0 = vector.load %arg1[%c0, %c0_0] : memref<8x1024xf32, #tpu.memory_space<vmem>>, vector<8x1024xf32>
    %c0_1 = arith.constant 0 : index
    %c0_2 = arith.constant 0 : index
    %1 = vector.load %arg2[%c0_1, %c0_2] : memref<8x1024xf32, #tpu.memory_space<vmem>>, vector<8x1024xf32>
    %cst = arith.constant 1.000000e-01 : f32
    %2 = vector.broadcast %cst : f32 to vector<8x1024xf32>
    %3 = arith.mulf %1, %2 : vector<8x1024xf32>
    %4 = arith.addf %0, %3 : vector<8x1024xf32>
    %c0_3 = arith.constant 0 : index
    %c0_4 = arith.constant 0 : index
    %5 = vector.load %arg3[%c0_3, %c0_4] : memref<8x1024xf32, #tpu.memory_space<vmem>>, vector<8x1024xf32>
    tpu.vector_store %arg3[%c0_3, %c0_4], %4 {strides = array<i32>} : memref<8x1024xf32, #tpu.memory_space<vmem>>, vector<8x1024xf32>,
    return
  }
  func.func @transform_0(%arg0: i32) -> (i32, i32) {
    %c0_i32 = arith.constant 0 : i32
    %c0_i32_0 = arith.constant 0 : i32
    return %arg0, %c0_i32 : i32, i32
  }
  func.func @transform_1(%arg0: i32) -> (i32, i32) {
    %c0_i32 = arith.constant 0 : i32
    %c0_i32_0 = arith.constant 0 : i32
    return %arg0, %c0_i32 : i32, i32
  }
  func.func @transform_2(%arg0: i32) -> (i32, i32) {
    %c0_i32 = arith.constant 0 : i32
    %c0_i32_0 = arith.constant 0 : i32
    return %arg0, %c0_i32 : i32, i32
  }
}

</mosaic_0001>

<bundles_post_ra>
// kernel: tpu_custom_call.1
= control target key start
LH: loop header
LB: loop body
LE: loop exit
PB: predicated region body
PF: predicated region fallthrough
CT: control target
= control target key end

     0   :  { %7 = vsyncpa [#allocation3], 0  ;;  %s206_s0 = inlined_call_operand.hbm [shape: f32[8,1024], index: 0, kind: input, shape index: {}]   ;;  %s207_s1 = inlined_call_operand.hbm [shape: f32[8,1024], index: 1, kind: input, shape index: {}]   ;;  %s208_s2 = inlined_call_operand.hbm [shape: f32[8,1024], index: 2, kind: output, shape index: {}]  }
   0x1   :  { %8 = vsyncpa [#allocation6], 0 }
   0x2   :  { %9 = vsyncpa [#allocation4], 0  ;;  %s15_s11 = sshll.u32 %s206_s0, 4  ;;  %s179_s12 = smov [#allocation2]   ;;  %s16_s11 = int_to_ptr.hbm [resolvable:$true] %s15_s11 }
   0x3   :  { %s17_s13 = sshll.u32 %s179_s12, 4  ;;  %s26_s16 = sshll.u32 %s207_s1, 4  ;;  %s18_s13 = int_to_ptr.vmem [resolvable:$true] %s17_s13  ;;  %s27_s16 = int_to_ptr.hbm [resolvable:$true] %s26_s16 }
   0x4   :  { %20 = dma.hbm_to_vmem [thread:$0]  %s16_s11, 1024, %s18_s13, [#allocation3]  }
   0x5   :  { %s180_s17 = smov [#allocation5]  }
   0x6   :  { %s28_s18 = sshll.u32 %s180_s17, 4  ;;  %s29_s18 = int_to_ptr.vmem [resolvable:$true] %s28_s18 }
   0x7   :  { %31 = dma.hbm_to_vmem [thread:$0]  %s27_s16, 1024, %s29_s18, [#allocation6]  }
   0x8   :  { %173 = dma.done.wait [#allocation3], 1024  }
   0x9   :  { %174 = vsyncadd [#allocation3], 4294966272 }
   0xa   :  { %175 = dma.done.wait [#allocation6], 1024  }
   0xb   :  { %176 = vsyncadd [#allocation6], 4294966272  ;;  %v40_v0 = vld [vmem:[#allocation2] sm:$0xff]  ;;  %v41_v2 = vld [vmem:[#allocation2 + $0x8] sm:$0xff]  ;;  %s181_s0 = smov [#allocation7]   ;;  %s87_s21 = sshll.u32 %s208_s2, 4  ;;  %s88_s21 = int_to_ptr.hbm [resolvable:$true] %s87_s21 }
   0xc   :  { %v48_v1 = vld [vmem:[#allocation5] sm:$0xff]  ;;  %v49_v4 = vld [vmem:[#allocation5 + $0x8] sm:$0xff]  ;;  %v42_v5 = vld [vmem:[#allocation2 + $0x10] sm:$0xff]  ;;  %s85_s1 = sshll.u32 %s181_s0, 4  ;;  %s86_s1 = int_to_ptr.vmem [resolvable:$true] %s85_s1 }
   0xd   :  { %v56_v3 = vmul.f32 0.1, %v48_v1  ;;  %v50_v6 = vld [vmem:[#allocation5 + $0x10] sm:$0xff]  ;;  %v57_v7 = vmul.f32 0.1, %v49_v4  ;;  %v43_v9 = vld [vmem:[#allocation2 + $0x18] sm:$0xff] }
   0xe   :  { %v58_v8 = vmul.f32 0.1, %v50_v6  ;;  %v51_v10 = vld [vmem:[#allocation5 + $0x18] sm:$0xff]  ;;  %v44_v13 = vld [vmem:[#allocation2 + $0x20] sm:$0xff]  ;;  %v45_v15 = vld [vmem:[#allocation2 + $0x28] sm:$0xff] }
   0xf   :  { %v64_v11 = vadd.f32 %v56_v3, %v40_v0  ;;  %v59_v12 = vmul.f32 0.1, %v51_v10  ;;  %v52_v14 = vld [vmem:[#allocation5 + $0x20] sm:$0xff]  ;;  %v65_v16 = vadd.f32 %v57_v7, %v41_v2  ;;  %v53_v19 = vld [vmem:[#allocation5 + $0x28] sm:$0xff]  ;;  %v46_v20 = vld [vmem:[#allocation2 + $0x30] sm:$0xff] }
  0x10   :  { %v66_v17 = vadd.f32 %v58_v8, %v42_v5  ;;  %v60_v18 = vmul.f32 0.1, %v52_v14  ;;  %v54_v21 = vld [vmem:[#allocation5 + $0x30] sm:$0xff]  ;;  %v61_v23 = vmul.f32 0.1, %v53_v19  ;;  %v47_v26 = vld [vmem:[#allocation2 + $0x38] sm:$0xff] }
  0x11   :  { %72 = vst [vmem:[#allocation7] sm:$0xff] %v64_v11  ;;  %v67_v22 = vadd.f32 %v59_v12, %v43_v9  ;;  %v62_v24 = vmul.f32 0.1, %v54_v21  ;;  %v55_v27 = vld [vmem:[#allocation5 + $0x38] sm:$0xff] }
  0x12   :  { %73 = vst [vmem:[#allocation7 + $0x8] sm:$0xff] %v65_v16  ;;  %v68_v25 = vadd.f32 %v60_v18, %v44_v13  ;;  %v69_v28 = vadd.f32 %v61_v23, %v45_v15  ;;  %v63_v30 = vmul.f32 0.1, %v55_v27 }
  0x13   :  { %74 = vst [vmem:[#allocation7 + $0x10] sm:$0xff] %v66_v17  ;;  %v70_v29 = vadd.f32 %v62_v24, %v46_v20 }
  0x14   :  { %75 = vst [vmem:[#allocation7 + $0x18] sm:$0xff] %v67_v22  ;;  %v71_v31 = vadd.f32 %v63_v30, %v47_v26 }
  0x15   :  { %76 = vst [vmem:[#allocation7 + $0x20] sm:$0xff] %v68_v25 }
  0x16   :  { %77 = vst [vmem:[#allocation7 + $0x28] sm:$0xff] %v69_v28 }
  0x17   :  { %78 = vst [vmem:[#allocation7 + $0x30] sm:$0xff] %v70_v29 }
  0x18   :  { %79 = vst [vmem:[#allocation7 + $0x38] sm:$0xff] %v71_v31 }
  0x19   :  { %90 = dma.vmem_to_hbm [thread:$0]  %s86_s1, 1024, %s88_s21, [#allocation4]  }
  0x1a   :  { %177 = dma.done.wait [#allocation4], 1024  }
  0x1b   :  { %178 = vsyncadd [#allocation4], 4294966272 }
  0x1c   :  { %95 = vsyncpa [#allocation3], 1 }
  0x1d   :  { %96 = vsyncpa [#allocation6], 1 }
  0x1e   :  { %97 = vsyncpa [#allocation4], 1 }

</bundles_post_ra>
